<compile_context>
chip_gen: v5e
topology: v5e:2x2
jax: 0.10.0
libtpu: 0.0.40
codegen_flags: <defaults>
</compile_context>

<pallas_src>
import jax
import jax.numpy as jnp
from jax import lax
from jax.experimental import pallas as pl
from jax.experimental.pallas import tpu as pltpu


def attention_kernel(x_ref, w1_ref, w2_ref, out_ref, attn_ref):
    x = x_ref[...]         # (n, in_feature)  -- input dtype (f32 or bf16)
    w1 = w1_ref[...]       # (hidden, in_feature)
    w2 = w2_ref[...]       # (out_feature, hidden)

    # h = tanh(W1 @ X^T) without materializing X^T: contract the last dim of
    # both operands so the MXU consumes them in place.  (hidden, n), f32 acc.
    h = jnp.tanh(
        lax.dot_general(
            w1, x,
            dimension_numbers=(((1,), (1,)), ((), ())),
            preferred_element_type=jnp.float32,
        )
    )

    # s = W2 @ h : (out_feature, n), f32 accumulate (cast h to the MXU dtype).
    s = jnp.dot(w2, h.astype(w2.dtype), preferred_element_type=jnp.float32)

    # Numerically stable softmax over n, kept in f32 (VPU/EUP math).
    s_max = jnp.max(s, axis=-1, keepdims=True)
    e = jnp.exp(s - s_max)
    denom = jnp.sum(e, axis=-1, keepdims=True)
    # EUP approximate reciprocal + one Newton refinement step (~f32 accurate).
    r = pl.reciprocal(denom, approx=True)
    r = r * (2.0 - denom * r)
    attn = e * r                               # (out_feature, n), f32

    # out = attn @ X : (out_feature, in_feature), f32 accumulate.
    out = jnp.dot(attn.astype(x.dtype), x, preferred_element_type=jnp.float32)

    out_ref[...] = out.astype(out_ref.dtype)
    attn_ref[...] = attn.astype(attn_ref.dtype)


def _vmem_limit_bytes(n, in_feature, hidden, out_feature, in_itemsize):
    # BlockSpec double-buffers each input/output block; add intermediates and
    # generous headroom, cap under the v7x scoped ceiling.
    per_step = (
        2 * n * in_feature * in_itemsize          # X block
        + 2 * hidden * in_feature * in_itemsize   # w1
        + 2 * out_feature * hidden * in_itemsize  # w2
        + 2 * out_feature * in_feature * 4        # out block (f32)
        + 2 * out_feature * n * 4                 # attn block (f32)
        + (hidden * n + 4 * out_feature * n) * 4  # h, s, e, attn, scratch
    )
    return min(32 * 1024 * 1024, max(4 * 1024 * 1024, 8 * per_step))


def attention_forward_batched(Xb, w1, w2, *, mxu_dtype=None):
    """Batched forward: Xb is (B, n, in_feature); weights are shared."""
    B, n, in_feature = Xb.shape
    hidden, _ = w1.shape
    out_feature, _ = w2.shape

    if mxu_dtype is not None:
        # Cast MXU operands at the boundary (halves HBM/VMEM; v6e/v7x bf16 MXU).
        Xb = Xb.astype(mxu_dtype)
        w1 = w1.astype(mxu_dtype)
        w2 = w2.astype(mxu_dtype)

    out_shapes = (
        jax.ShapeDtypeStruct((B, out_feature, in_feature), jnp.float32),
        jax.ShapeDtypeStruct((B, out_feature, n), jnp.float32),
    )

    grid_spec = pltpu.PrefetchScalarGridSpec(
        num_scalar_prefetch=0,
        grid=(B,),
        in_specs=[
            # leading batch dim squeezed out of the kernel view
            pl.BlockSpec((None, n, in_feature), lambda b: (b, 0, 0)),
            pl.BlockSpec((hidden, in_feature), lambda b: (0, 0)),   # resident
            pl.BlockSpec((out_feature, hidden), lambda b: (0, 0)),  # resident
        ],
        out_specs=(
            pl.BlockSpec((None, out_feature, in_feature), lambda b: (b, 0, 0)),
            pl.BlockSpec((None, out_feature, n), lambda b: (b, 0, 0)),
        ),
    )

    return pl.pallas_call(
        attention_kernel,
        out_shape=out_shapes,
        grid_spec=grid_spec,
        compiler_params=pltpu.CompilerParams(
            # independent batch items: shard across v7x's 2 TCs (no-op v5e/v6e)
            dimension_semantics=("parallel",),
            vmem_limit_bytes=_vmem_limit_bytes(
                n, in_feature, hidden, out_feature, Xb.dtype.itemsize),
        ),
    )(Xb, w1, w2)


def attention_forward(X, w1, w2, *, mxu_dtype=None):
    """Single-problem forward with the original module semantics."""
    out, attn = attention_forward_batched(X[None], w1, w2, mxu_dtype=mxu_dtype)
    return out[0], attn[0]


def xavier_normal(key, shape):
    # nn.init.xavier_normal_ with gain=1: std = sqrt(2 / (fan_in + fan_out))
    fan_out, fan_in = shape
    std = (2.0 / (fan_in + fan_out)) ** 0.5
    return std * jax.random.normal(key, shape, dtype=jnp.float32)


def ref_forward(Xb, w1, w2):
    # Pure-JAX reference (batched).
    h = jnp.tanh(jnp.einsum('hf,bnf->bhn', w1, Xb))
    s = jnp.einsum('oh,bhn->bon', w2, h)
    attn = jax.nn.softmax(s, axis=-1)
    out = jnp.einsum('bon,bnf->bof', attn, Xb)
    return out, attn


if __name__ == "__main__":
    n, in_feature, hidden, out_feature, B = 8, 32, 16, 4, 4

    key = jax.random.PRNGKey(0)
    kx, kb, k1, k2 = jax.random.split(key, 4)

    X = jax.random.normal(kx, (n, in_feature), dtype=jnp.float32)
    Xb = jax.random.normal(kb, (B, n, in_feature), dtype=jnp.float32)
    w1 = xavier_normal(k1, (hidden, in_feature))
    w2 = xavier_normal(k2, (out_feature, hidden))

    # 1) Single-problem path (exact module semantics), f32.
    out, attn = attention_forward(X, w1, w2)
    jax.block_until_ready((out, attn))
    out_r, attn_r = ref_forward(X[None], w1, w2)
    assert out.shape == (out_feature, in_feature)
    assert attn.shape == (out_feature, n)
    assert jnp.allclose(out, out_r[0], atol=1e-4, rtol=1e-4), "out mismatch"
    assert jnp.allclose(attn, attn_r[0], atol=1e-4, rtol=1e-4), "attn mismatch"

    # 2) Batched path: grid=(B,), "parallel" semantics, f32.
    out_b, attn_b = attention_forward_batched(Xb, w1, w2)
    jax.block_until_ready((out_b, attn_b))
    out_br, attn_br = ref_forward(Xb, w1, w2)
    assert jnp.allclose(out_b, out_br, atol=1e-4, rtol=1e-4), "batched out mismatch"
    assert jnp.allclose(attn_b, attn_br, atol=1e-4, rtol=1e-4), "batched attn mismatch"

    # 3) bf16 MXU-operand path (v6e/v7x fast path; also valid bf16 MXU on v5e).
    out_16, attn_16 = attention_forward_batched(Xb, w1, w2, mxu_dtype=jnp.bfloat16)
    jax.block_until_ready((out_16, attn_16))
    Xc = Xb.astype(jnp.bfloat16).astype(jnp.float32)
    w1c = w1.astype(jnp.bfloat16).astype(jnp.float32)
    w2c = w2.astype(jnp.bfloat16).astype(jnp.float32)
    out_cr, attn_cr = ref_forward(Xc, w1c, w2c)
    assert jnp.allclose(out_16, out_cr, atol=5e-2, rtol=5e-2), "bf16 out mismatch"
    assert jnp.allclose(attn_16, attn_cr, atol=5e-2, rtol=5e-2), "bf16 attn mismatch"

    print("KERNEL_OK")
</pallas_src>

<mosaic_0001>
module attributes {stable_mosaic.version = 11 : i64} {
  func.func @attention_kernel(%arg0: i32, %arg1: memref<1x8x32xf32, #tpu.memory_space<vmem>>, %arg2: memref<16x32xf32, #tpu.memory_space<vmem>>, %arg3: memref<4x16xf32, #tpu.memory_space<vmem>>, %arg4: memref<1x4x32xf32, #tpu.memory_space<vmem>>, %arg5: memref<1x4x8xf32, #tpu.memory_space<vmem>>) attributes {dimension_semantics = [#tpu.dimension_semantics<parallel>], iteration_bounds = array<i64: 1>, scalar_prefetch = 0 : i64, scratch_operands = 0 : i64, tpu.core_type = #tpu.core_type<tc>, window_params = [{transform_indices = @transform_0, window_bounds = array<i64: 1, 8, 32>}, {pipeline_mode = #tpu.pipeline_mode<synchronous>, transform_indices = @transform_1, window_bounds = array<i64: 16, 32>}, {pipeline_mode = #tpu.pipeline_mode<synchronous>, transform_indices = @transform_2, window_bounds = array<i64: 4, 16>}, {transform_indices = @transform_3, window_bounds = array<i64: 1, 4, 32>}, {transform_indices = @transform_4, window_bounds = array<i64: 1, 4, 8>}]} {
    %c0 = arith.constant 0 : index
    %c0_0 = arith.constant 0 : index
    %c0_1 = arith.constant 0 : index
    %0 = vector.load %arg1[%c0, %c0_0, %c0_1] : memref<1x8x32xf32, #tpu.memory_space<vmem>>, vector<1x8x32xf32>
    %1 = vector.shape_cast %0 : vector<1x8x32xf32> to vector<8x32xf32>
    %c0_2 = arith.constant 0 : index
    %c0_3 = arith.constant 0 : index
    %2 = vector.load %arg2[%c0_2, %c0_3] : memref<16x32xf32, #tpu.memory_space<vmem>>, vector<16x32xf32>
    %c0_4 = arith.constant 0 : index
    %c0_5 = arith.constant 0 : index
    %3 = vector.load %arg3[%c0_4, %c0_5] : memref<4x16xf32, #tpu.memory_space<vmem>>, vector<4x16xf32>
    %cst = arith.constant dense<0.000000e+00> : vector<16x8xf32>
    %4 = tpu.matmul %2, %1, %cst {dimension_numbers = #tpu.dot_dimension_numbers<[1], [1], [0], [0], [0, 0, 1, 0], [], []>} : vector<16x32xf32>, vector<8x32xf32>, vector<16x8xf32> -> vector<16x8xf32>
    %5 = math.tanh %4 : vector<16x8xf32>
    %cst_6 = arith.constant dense<0.000000e+00> : vector<4x8xf32>
    %6 = tpu.matmul %3, %5, %cst_6 {dimension_numbers = #tpu.dot_dimension_numbers<[1], [0], [0], [1], [0, 0, 1, 1], [], []>} : vector<4x16xf32>, vector<16x8xf32>, vector<4x8xf32> -> vector<4x8xf32>
    %cst_7 = arith.constant dense<0xFF800000> : vector<4xf32>
    %7 = vector.multi_reduction <maximumf>, %6, %cst_7 [1] : vector<4x8xf32> to vector<4xf32>
    %8 = vector.shape_cast %7 : vector<4xf32> to vector<4x1xf32>
    %9 = vector.broadcast %8 : vector<4x1xf32> to vector<4x8xf32>
    %10 = arith.subf %6, %9 : vector<4x8xf32>
    %11 = math.exp %10 : vector<4x8xf32>
    %cst_8 = arith.constant dense<0.000000e+00> : vector<4xf32>
    %12 = vector.multi_reduction <add>, %11, %cst_8 [1] : vector<4x8xf32> to vector<4xf32>
    %13 = vector.shape_cast %12 : vector<4xf32> to vector<4x1xf32>
    %14 = tpu.reciprocal %13 {approx = true} : vector<4x1xf32> -> vector<4x1xf32>
    %15 = arith.mulf %13, %14 : vector<4x1xf32>
    %cst_9 = arith.constant 2.000000e+00 : f32
    %16 = vector.broadcast %cst_9 : f32 to vector<4x1xf32>
    %17 = arith.subf %16, %15 : vector<4x1xf32>
    %18 = arith.mulf %14, %17 : vector<4x1xf32>
    %19 = vector.broadcast %18 : vector<4x1xf32> to vector<4x8xf32>
    %20 = arith.mulf %11, %19 : vector<4x8xf32>
    %cst_10 = arith.constant dense<0.000000e+00> : vector<4x32xf32>
    %21 = tpu.matmul %20, %1, %cst_10 {dimension_numbers = #tpu.dot_dimension_numbers<[1], [0], [0], [1], [0, 0, 1, 1], [], []>} : vector<4x8xf32>, vector<8x32xf32>, vector<4x32xf32> -> vector<4x32xf32>
    %c0_11 = arith.constant 0 : index
    %c0_12 = arith.constant 0 : index
    %c0_13 = arith.constant 0 : index
    %22 = vector.load %arg4[%c0_11, %c0_12, %c0_13] : memref<1x4x32xf32, #tpu.memory_space<vmem>>, vector<1x4x32xf32>
    %23 = vector.shape_cast %22 : vector<1x4x32xf32> to vector<4x32xf32>
    %24 = vector.shape_cast %21 : vector<4x32xf32> to vector<1x4x32xf32>
    tpu.vector_store %arg4[%c0_11, %c0_12, %c0_13], %24 {strides = array<i32>} : memref<1x4x32xf32, #tpu.memory_space<vmem>>, vector<1x4x32xf32>,
    %c0_14 = arith.constant 0 : index
    %c0_15 = arith.constant 0 : index
    %c0_16 = arith.constant 0 : index
    %25 = vector.load %arg5[%c0_14, %c0_15, %c0_16] : memref<1x4x8xf32, #tpu.memory_space<vmem>>, vector<1x4x8xf32>
    %26 = vector.shape_cast %25 : vector<1x4x8xf32> to vector<4x8xf32>
    %27 = vector.shape_cast %20 : vector<4x8xf32> to vector<1x4x8xf32>
    tpu.vector_store %arg5[%c0_14, %c0_15, %c0_16], %27 {strides = array<i32>} : memref<1x4x8xf32, #tpu.memory_space<vmem>>, vector<1x4x8xf32>,
    return
  }
  func.func @transform_0(%arg0: i32) -> (i32, i32, i32) {
    %c0_i32 = arith.constant 0 : i32
    %c0_i32_0 = arith.constant 0 : i32
    %c0_i32_1 = arith.constant 0 : i32
    return %arg0, %c0_i32, %c0_i32_0 : i32, i32, i32
  }
  func.func @transform_1(%arg0: i32) -> (i32, i32) {
    %c0_i32 = arith.constant 0 : i32
    %c0_i32_0 = arith.constant 0 : i32
    %c0_i32_1 = arith.constant 0 : i32
    return %c0_i32, %c0_i32_0 : i32, i32
  }
  func.func @transform_2(%arg0: i32) -> (i32, i32) {
    %c0_i32 = arith.constant 0 : i32
    %c0_i32_0 = arith.constant 0 : i32
    %c0_i32_1 = arith.constant 0 : i32
    return %c0_i32, %c0_i32_0 : i32, i32
  }
  func.func @transform_3(%arg0: i32) -> (i32, i32, i32) {
    %c0_i32 = arith.constant 0 : i32
    %c0_i32_0 = arith.constant 0 : i32
    %c0_i32_1 = arith.constant 0 : i32
    return %arg0, %c0_i32, %c0_i32_0 : i32, i32, i32
  }
  func.func @transform_4(%arg0: i32) -> (i32, i32, i32) {
    %c0_i32 = arith.constant 0 : i32
    %c0_i32_0 = arith.constant 0 : i32
    %c0_i32_1 = arith.constant 0 : i32
    return %arg0, %c0_i32, %c0_i32_0 : i32, i32, i32
  }
}

</mosaic_0001>

<bundles_post_ra>
// kernel: tpu_custom_call.1
= control target key start
LH: loop header
LB: loop body
LE: loop exit
PB: predicated region body
PF: predicated region fallthrough
CT: control target
= control target key end

     0   :  { %10 = vsyncpa [#allocation3], 0  ;;  %s399_s0 = inlined_call_operand.hbm [shape: f32[1,8,32], index: 0, kind: input, shape index: {}]   ;;  %s400_s1 = inlined_call_operand.hbm [shape: f32[16,32], index: 1, kind: input, shape index: {}]   ;;  %s401_s2 = inlined_call_operand.hbm [shape: f32[4,16], index: 2, kind: input, shape index: {}]   ;;  %s402_s3 = inlined_call_operand.hbm [shape: f32[1,4,32], index: 3, kind: output, shape index: {0}]   ;;  %s403_s4 = inlined_call_operand.hbm [shape: f32[1,4,8], index: 4, kind: output, shape index: {1}]  }
   0x1   :  { %11 = vsyncpa [#allocation6], 0 }
   0x2   :  { %12 = vsyncpa [#allocation4], 0  ;;  %s29_s17 = sshll.u32 %s400_s1, 4  ;;  %s30_s17 = int_to_ptr.hbm [resolvable:$true] %s29_s17 }
   0x3   :  { %13 = vsyncpa [#allocation10], 0  ;;  %s349_s18 = smov [#allocation5]   ;;  %s19_s22 = sshll.u32 %s399_s0, 4  ;;  %s20_s22 = int_to_ptr.hbm [resolvable:$true] %s19_s22 }
   0x4   :  { %s31_s19 = sshll.u32 %s349_s18, 4  ;;  %s350_s23 = smov 128   ;;  %s32_s19 = int_to_ptr.vmem [resolvable:$true] %s31_s19 }
   0x5   :  { %s351_s24 = smov 8   ;;  %s352_s25 = smov [#allocation2]  }
   0x6   :  { %37 = dma.hbm_to_vmem [thread:$0]  %s30_s17, 256, %s32_s19, [#allocation6], %s350_s23, %s350_s23, %s351_s24  }
   0x7   :  { %s21_s26 = sshll.u32 %s352_s25, 4  ;;  %s43_s29 = sshll.u32 %s401_s2, 4  ;;  %s22_s26 = int_to_ptr.vmem [resolvable:$true] %s21_s26  ;;  %s44_s29 = int_to_ptr.hbm [resolvable:$true] %s43_s29 }
   0x8   :  { %24 = dma.hbm_to_vmem [thread:$0]  %s20_s22, 128, %s22_s26, [#allocation3]  }
   0x9   :  { %s353_s1 = smov [#allocation7]  }
   0xa   :  { %s45_s30 = sshll.u32 %s353_s1, 4  ;;  %s46_s30 = int_to_ptr.vmem [resolvable:$true] %s45_s30 }
   0xb   :  { %48 = dma.hbm_to_vmem [thread:$0]  %s44_s29, 64, %s46_s30, [#allocation6]  }
   0xc   :  { %341 = dma.done.wait [#allocation3], 128  }
   0xd   :  { %342 = vsyncadd [#allocation3], 4294967168 }
   0xe   :  { %343 = dma.done.wait [#allocation6], 320  }
   0xf   :  { %344 = vsyncadd [#allocation6], 4294966976  ;;  %vm65_vm0 = vcmask 261120   ;;  %v61_v0 = vld [vmem:[#allocation2] sm:$0xff]  ;;  %v63_v1 = vld [vmem:[#allocation5 + $0x8] sm:$0xff]  ;;  %vm100_vm1 = vcmask 130048  }
  0x10   :  { %205 = vmatpush.xpose.msk.msra.mxu3 %vm65_vm0, %v61_v0  ;;  %200 = vmatpush.xpose.msk.msra.mxu0 %vm65_vm0, %v61_v0  ;;  %v62_v2 = vld [vmem:[#allocation5] sm:$0xff]  ;;  %v64_v7 = vld [vmem:[#allocation7] sm:$0xf]  ;;  %vm124_vm2 = vcmask 60416   ;;  %vm139_vm3 = vcmask 64512   ;;  %s354_s0 = smov [#allocation9]  }
  0x11   :  { %158 = vmatpush.msra.mxu2 %v61_v0  ;;  %s182_s2 = sshll.u32 %s354_s0, 4  ;;  %s184_s7 = sshll.u32 %s403_s4, 4  ;;  %vm163_vm4 = vcmask 257024   ;;  %s183_s2 = int_to_ptr.vmem [resolvable:$true] %s182_s2  ;;  %s185_s7 = int_to_ptr.hbm [resolvable:$true] %s184_s7 }
  0x12   :  { %s355_s8 = smov [#allocation8]   ;;  %s173_s12 = sshll.u32 %s402_s3, 4  ;;  %s174_s12 = int_to_ptr.hbm [resolvable:$true] %s173_s12 }
  0x13   :  { %202 = vmatmul.msk.f32.vlgmr.msra.gmra.mxu3 %vm65_vm0, %v63_v1  ;;  %201 = vmatmul.msk.f32.vlgmr.msra.gmra.mxu0 %vm65_vm0, %v62_v2  ;;  %s171_s9 = sshll.u32 %s355_s8, 4  ;;  %s172_s9 = int_to_ptr.vmem [resolvable:$true] %s171_s9 }
  0x90   :  { %v92_v3 = vpop.f32.mrf.mxu0 }
  0x91   :  { %213 = vtanh.f32 %v92_v3 }
  0x96   :  { %v95_v4 = vpop.f32.mrf.mxu3 }
  0x97   :  { %215 = vtanh.f32 %v95_v4  ;;  %v214_v5 = vpop.eup %213 }
  0x9d   :  { %v216_v6 = vpop.eup %215 }
  0x9e   :  { %118 = vmatpush.msra.mxu1 %v216_v6 }
  0xa0   :  { %119 = vmatpush.msra.mxu1 %v214_v5 }
  0xa1   :  { %203 = vmatmul.msk.f32.vlgmr.msra.gmra.mxu1 %vm100_vm1, %v64_v7 }
 0x11e   :  { %v121_v8 = vpop.f32.mrf.mxu1 }
 0x11f   :  { %v125_v9 = vsel %vm124_vm2, %v121_v8, -inf }
 0x120   :  { %126 = vmax.xlane.f32.xlu0 %v125_v9 }
 0x193   :  { %v127_v10 = vpop.xlane.xlu0 %126 }
 0x194   :  { %v128_v11 = vsub.f32 %v121_v8, %v127_v10 }
 0x196   :  { %v129_v12 = vmul.f32 1.442695, %v128_v11 }
 0x198   :  { %217 = vpow2.f32 %v129_v12 }
 0x19e   :  { %v218_v13 = vpop.eup %217 }
 0x19f   :  { %v131_v14 = vsel %vm124_vm2, %v218_v13, 0.0 }
 0x1a0   :  { %132 = vadd.xlane.f32.xlu0 %v131_v14 }
 0x213   :  { %v133_v15 = vpop.xlane.xlu0 %132 }
 0x214   :  { %219 = vrcp.f32 %v133_v15 }
 0x21a   :  { %v220_v16 = vpop.eup %219 }
 0x21b   :  { %v135_v17 = vmul.f32 %v220_v16, %v133_v15 }
 0x21d   :  { %v136_v18 = vsub.f32 2.0, %v135_v17 }
 0x21f   :  { %v137_v19 = vmul.f32 %v220_v16, %v136_v18 }
 0x221   :  { %v138_v20 = vmul.f32 %v218_v13, %v137_v19 }
 0x223   :  { %204 = vmatmul.msk.f32.vlgmr.msra.gmra.mxu2 %vm139_vm3, %v138_v20  ;;  %165 = vst.msk [vmem:[#allocation9] sm:$0xf] %vm124_vm2, %v138_v20 }
 0x224   :  { %187 = dma.vmem_to_hbm [thread:$0]  %s183_s2, 64, %s185_s7, [#allocation10]  }
 0x2a6   :  { %v160_v21 = vpop.f32.mrf.mxu2 }
 0x2a7   :  { %164 = vst.msk [vmem:[#allocation8] sm:$0xf] %vm163_vm4, %v160_v21 }
 0x2a8   :  { %176 = dma.vmem_to_hbm [thread:$0]  %s172_s9, 64, %s174_s12, [#allocation4]  }
 0x2a9   :  { %345 = dma.done.wait [#allocation4], 64  }
 0x2aa   :  { %346 = vsyncadd [#allocation4], 4294967232 }
 0x2ab   :  { %347 = dma.done.wait [#allocation10], 64  }
 0x2ac   :  { %348 = vsyncadd [#allocation10], 4294967232 }
 0x2ad   :  { %196 = vsyncpa [#allocation3], 1 }
 0x2ae   :  { %197 = vsyncpa [#allocation6], 1 }
 0x2af   :  { %198 = vsyncpa [#allocation4], 1 }
 0x2b0   :  { %199 = vsyncpa [#allocation10], 1 }

</bundles_post_ra>
